<compile_context>
chip_gen: v6e
topology: v6e:2x2x1
jax: 0.10.0
libtpu: 0.0.40
codegen_flags: <defaults>
</compile_context>

<pallas_src>
import functools

import jax
import jax.numpy as jnp
from jax.experimental import pallas as pl
from jax.experimental.pallas import tpu as pltpu

LANE = 128


def _round_up(n, m):
    return (n + m - 1) // m * m


def _pad2d(a, rows, cols):
    return jnp.pad(a, ((0, rows - a.shape[0]), (0, cols - a.shape[1])))


def mlp_kernel(x_ref, w1_ref, b1_ref, w2_ref, b2_ref,
               w3_ref, b3_ref, w4_ref, b4_ref, o_ref):
    wdt = w1_ref.dtype  # MXU input dtype (bf16 by default)

    # layer 1: Linear(input_dim, 128) + ReLU  (dropout p=0.2 -> identity, eval)
    h = jnp.dot(x_ref[...].astype(wdt), w1_ref[...],
                preferred_element_type=jnp.float32) + b1_ref[...]
    h = jnp.maximum(h, 0.0)
    # layer 2: Linear(128, 64) + ReLU   (64 zero-padded to 128 lanes)
    h = jnp.dot(h.astype(wdt), w2_ref[...],
                preferred_element_type=jnp.float32) + b2_ref[...]
    h = jnp.maximum(h, 0.0)
    # layer 3: Linear(64, 32) + ReLU    (32 zero-padded to 128 lanes)
    h = jnp.dot(h.astype(wdt), w3_ref[...],
                preferred_element_type=jnp.float32) + b3_ref[...]
    h = jnp.maximum(h, 0.0)
    # output layer: Linear(32, output_dim)   (output zero-padded to 128 lanes)
    out = jnp.dot(h.astype(wdt), w4_ref[...],
                  preferred_element_type=jnp.float32) + b4_ref[...]
    o_ref[...] = out.astype(o_ref.dtype)


def linear_classification_forward(x, params, *, block_b=512,
                                  weight_dtype=jnp.bfloat16):
    """x: (B, input_dim) f32. params: w1..w4 stored (in, out), b1..b4 (out,)."""
    B, in_dim = x.shape
    out_dim = params["w4"].shape[1]
    outp = _round_up(out_dim, LANE)
    h1 = h2 = h3 = LANE  # logical hidden widths 128/64/32, zero-padded to 128

    # Lane-dense, zero-padded parameters: weights -> bf16 (MXU), biases f32 (VPU).
    w1 = _pad2d(params["w1"], in_dim, h1).astype(weight_dtype)
    w2 = _pad2d(params["w2"], h1, h2).astype(weight_dtype)
    w3 = _pad2d(params["w3"], h2, h3).astype(weight_dtype)
    w4 = _pad2d(params["w4"], h3, outp).astype(weight_dtype)
    b1 = _pad2d(params["b1"][None, :], 1, h1).astype(jnp.float32)
    b2 = _pad2d(params["b2"][None, :], 1, h2).astype(jnp.float32)
    b3 = _pad2d(params["b3"][None, :], 1, h3).astype(jnp.float32)
    b4 = _pad2d(params["b4"][None, :], 1, outp).astype(jnp.float32)

    # Batch tiling: TB rows per grid step (sublane aligned); pad B up to a
    # multiple of TB so every block is full.
    TB = min(block_b, _round_up(B, 8))
    Bp = _round_up(B, TB)
    if Bp != B:
        x = jnp.pad(x, ((0, Bp - B), (0, 0)))
    grid = (Bp // TB,)

    flops = 2 * Bp * (in_dim * h1 + h1 * h2 + h2 * h3 + h3 * outp)
    bytes_accessed = (Bp * in_dim * 4 + Bp * outp * 4
                      + (w1.size + w2.size + w3.size + w4.size) * 2
                      + (b1.size + b2.size + b3.size + b4.size) * 4)

    resident = lambda i: (0, 0)  # weights/biases: same block on every grid step

    out_padded = pl.pallas_call(
        mlp_kernel,
        out_shape=jax.ShapeDtypeStruct((Bp, outp), jnp.float32),
        grid_spec=pltpu.PrefetchScalarGridSpec(
            num_scalar_prefetch=0,
            grid=grid,
            in_specs=[
                pl.BlockSpec((TB, in_dim), lambda i: (i, 0)),  # x streams per tile
                pl.BlockSpec((in_dim, h1), resident),
                pl.BlockSpec((1, h1), resident),
                pl.BlockSpec((h1, h2), resident),
                pl.BlockSpec((1, h2), resident),
                pl.BlockSpec((h2, h3), resident),
                pl.BlockSpec((1, h3), resident),
                pl.BlockSpec((h3, outp), resident),
                pl.BlockSpec((1, outp), resident),
            ],
            out_specs=pl.BlockSpec((TB, outp), lambda i: (i, 0)),
        ),
        compiler_params=pltpu.CompilerParams(
            dimension_semantics=("parallel",),  # shard batch tiles across TCs (v7x)
        ),
        cost_estimate=pl.CostEstimate(flops=flops, transcendentals=0,
                                      bytes_accessed=bytes_accessed),
    )(x, w1, b1, w2, b2, w3, b3, w4, b4)

    return out_padded[:B, :out_dim]


def init_params(key, input_dim, output_dim):
    """Xavier-normal weights (matches the PyTorch module), uniform biases."""
    dims = [(input_dim, 128), (128, 64), (64, 32), (32, output_dim)]
    params = {}
    for i, (fan_in, fan_out) in enumerate(dims, start=1):
        key, kw, kb = jax.random.split(key, 3)
        std = (2.0 / (fan_in + fan_out)) ** 0.5
        # stored as (in, out) == transpose of PyTorch's (out, in) weight
        params[f"w{i}"] = std * jax.random.normal(kw, (fan_in, fan_out), jnp.float32)
        bound = 1.0 / (fan_in ** 0.5)
        params[f"b{i}"] = jax.random.uniform(
            kb, (fan_out,), jnp.float32, minval=-bound, maxval=bound)
    return params


def reference_forward(x, params, weight_dtype=jnp.bfloat16):
    """Plain-JAX reference with the same (bf16-weight, f32-accum) precision."""
    h = x
    for i in range(1, 5):
        w = params[f"w{i}"].astype(weight_dtype)
        h = jnp.dot(h.astype(weight_dtype), w,
                    preferred_element_type=jnp.float32) + params[f"b{i}"][None, :]
        if i < 4:
            h = jnp.maximum(h, 0.0)
    return h


if __name__ == "__main__":
    key = jax.random.PRNGKey(0)
    k_param, k_x = jax.random.split(key)

    input_dim, output_dim, batch = 32, 10, 256
    params = init_params(k_param, input_dim, output_dim)
    x = jax.random.normal(k_x, (batch, input_dim), jnp.float32)

    # block_b=128 -> 2 grid steps at batch=256 (exercises the pipelined grid).
    fwd = jax.jit(functools.partial(linear_classification_forward, block_b=128))
    out = jax.block_until_ready(fwd(x, params))

    ref = reference_forward(x, params)
    assert out.shape == (batch, output_dim)
    assert jnp.allclose(out, ref, atol=1e-3, rtol=1e-3), \
        float(jnp.max(jnp.abs(out - ref)))

    # TODO(synk): Dropout(p=0.2) is implemented as identity (eval semantics);
    # train-mode stochastic masking is not implemented in the kernel.
    print("KERNEL_OK")
</pallas_src>

<mosaic_0001>
module attributes {stable_mosaic.version = 11 : i64} {
  func.func @mlp_kernel(%arg0: i32, %arg1: memref<128x32xf32, #tpu.memory_space<vmem>>, %arg2: memref<32x128xbf16, #tpu.memory_space<vmem>>, %arg3: memref<1x128xf32, #tpu.memory_space<vmem>>, %arg4: memref<128x128xbf16, #tpu.memory_space<vmem>>, %arg5: memref<1x128xf32, #tpu.memory_space<vmem>>, %arg6: memref<128x128xbf16, #tpu.memory_space<vmem>>, %arg7: memref<1x128xf32, #tpu.memory_space<vmem>>, %arg8: memref<128x128xbf16, #tpu.memory_space<vmem>>, %arg9: memref<1x128xf32, #tpu.memory_space<vmem>>, %arg10: memref<128x128xf32, #tpu.memory_space<vmem>>) attributes {dimension_semantics = [#tpu.dimension_semantics<parallel>], iteration_bounds = array<i64: 2>, scalar_prefetch = 0 : i64, scratch_operands = 0 : i64, tpu.core_type = #tpu.core_type<tc>, window_params = [{transform_indices = @transform_0, window_bounds = array<i64: 128, 32>}, {pipeline_mode = #tpu.pipeline_mode<synchronous>, transform_indices = @transform_1, window_bounds = array<i64: 32, 128>}, {pipeline_mode = #tpu.pipeline_mode<synchronous>, transform_indices = @transform_2, window_bounds = array<i64: 1, 128>}, {pipeline_mode = #tpu.pipeline_mode<synchronous>, transform_indices = @transform_3, window_bounds = array<i64: 128, 128>}, {pipeline_mode = #tpu.pipeline_mode<synchronous>, transform_indices = @transform_4, window_bounds = array<i64: 1, 128>}, {pipeline_mode = #tpu.pipeline_mode<synchronous>, transform_indices = @transform_5, window_bounds = array<i64: 128, 128>}, {pipeline_mode = #tpu.pipeline_mode<synchronous>, transform_indices = @transform_6, window_bounds = array<i64: 1, 128>}, {pipeline_mode = #tpu.pipeline_mode<synchronous>, transform_indices = @transform_7, window_bounds = array<i64: 128, 128>}, {pipeline_mode = #tpu.pipeline_mode<synchronous>, transform_indices = @transform_8, window_bounds = array<i64: 1, 128>}, {transform_indices = @transform_9, window_bounds = array<i64: 128, 128>}]} {
    %c0 = arith.constant 0 : index
    %c0_0 = arith.constant 0 : index
    %0 = vector.load %arg1[%c0, %c0_0] : memref<128x32xf32, #tpu.memory_space<vmem>>, vector<128x32xf32>
    %1 = arith.truncf %0 : vector<128x32xf32> to vector<128x32xbf16>
    %c0_1 = arith.constant 0 : index
    %c0_2 = arith.constant 0 : index
    %2 = vector.load %arg2[%c0_1, %c0_2] : memref<32x128xbf16, #tpu.memory_space<vmem>>, vector<32x128xbf16>
    %cst = arith.constant dense<0.000000e+00> : vector<128x128xf32>
    %3 = tpu.matmul %1, %2, %cst {dimension_numbers = #tpu.dot_dimension_numbers<[1], [0], [0], [1], [0, 0, 1, 1], [], []>} : vector<128x32xbf16>, vector<32x128xbf16>, vector<128x128xf32> -> vector<128x128xf32>
    %c0_3 = arith.constant 0 : index
    %c0_4 = arith.constant 0 : index
    %4 = vector.load %arg3[%c0_3, %c0_4] : memref<1x128xf32, #tpu.memory_space<vmem>>, vector<1x128xf32>
    %5 = vector.broadcast %4 : vector<1x128xf32> to vector<128x128xf32>
    %6 = arith.addf %3, %5 : vector<128x128xf32>
    %cst_5 = arith.constant 0.000000e+00 : f32
    %7 = vector.broadcast %cst_5 : f32 to vector<128x128xf32>
    %8 = arith.maximumf %6, %7 : vector<128x128xf32>
    %9 = arith.truncf %8 : vector<128x128xf32> to vector<128x128xbf16>
    %c0_6 = arith.constant 0 : index
    %c0_7 = arith.constant 0 : index
    %10 = vector.load %arg4[%c0_6, %c0_7] : memref<128x128xbf16, #tpu.memory_space<vmem>>, vector<128x128xbf16>
    %cst_8 = arith.constant dense<0.000000e+00> : vector<128x128xf32>
    %11 = tpu.matmul %9, %10, %cst_8 {dimension_numbers = #tpu.dot_dimension_numbers<[1], [0], [0], [1], [0, 0, 1, 1], [], []>} : vector<128x128xbf16>, vector<128x128xbf16>, vector<128x128xf32> -> vector<128x128xf32>
    %c0_9 = arith.constant 0 : index
    %c0_10 = arith.constant 0 : index
    %12 = vector.load %arg5[%c0_9, %c0_10] : memref<1x128xf32, #tpu.memory_space<vmem>>, vector<1x128xf32>
    %13 = vector.broadcast %12 : vector<1x128xf32> to vector<128x128xf32>
    %14 = arith.addf %11, %13 : vector<128x128xf32>
    %cst_11 = arith.constant 0.000000e+00 : f32
    %15 = vector.broadcast %cst_11 : f32 to vector<128x128xf32>
    %16 = arith.maximumf %14, %15 : vector<128x128xf32>
    %17 = arith.truncf %16 : vector<128x128xf32> to vector<128x128xbf16>
    %c0_12 = arith.constant 0 : index
    %c0_13 = arith.constant 0 : index
    %18 = vector.load %arg6[%c0_12, %c0_13] : memref<128x128xbf16, #tpu.memory_space<vmem>>, vector<128x128xbf16>
    %cst_14 = arith.constant dense<0.000000e+00> : vector<128x128xf32>
    %19 = tpu.matmul %17, %18, %cst_14 {dimension_numbers = #tpu.dot_dimension_numbers<[1], [0], [0], [1], [0, 0, 1, 1], [], []>} : vector<128x128xbf16>, vector<128x128xbf16>, vector<128x128xf32> -> vector<128x128xf32>
    %c0_15 = arith.constant 0 : index
    %c0_16 = arith.constant 0 : index
    %20 = vector.load %arg7[%c0_15, %c0_16] : memref<1x128xf32, #tpu.memory_space<vmem>>, vector<1x128xf32>
    %21 = vector.broadcast %20 : vector<1x128xf32> to vector<128x128xf32>
    %22 = arith.addf %19, %21 : vector<128x128xf32>
    %cst_17 = arith.constant 0.000000e+00 : f32
    %23 = vector.broadcast %cst_17 : f32 to vector<128x128xf32>
    %24 = arith.maximumf %22, %23 : vector<128x128xf32>
    %25 = arith.truncf %24 : vector<128x128xf32> to vector<128x128xbf16>
    %c0_18 = arith.constant 0 : index
    %c0_19 = arith.constant 0 : index
    %26 = vector.load %arg8[%c0_18, %c0_19] : memref<128x128xbf16, #tpu.memory_space<vmem>>, vector<128x128xbf16>
    %cst_20 = arith.constant dense<0.000000e+00> : vector<128x128xf32>
    %27 = tpu.matmul %25, %26, %cst_20 {dimension_numbers = #tpu.dot_dimension_numbers<[1], [0], [0], [1], [0, 0, 1, 1], [], []>} : vector<128x128xbf16>, vector<128x128xbf16>, vector<128x128xf32> -> vector<128x128xf32>
    %c0_21 = arith.constant 0 : index
    %c0_22 = arith.constant 0 : index
    %28 = vector.load %arg9[%c0_21, %c0_22] : memref<1x128xf32, #tpu.memory_space<vmem>>, vector<1x128xf32>
    %29 = vector.broadcast %28 : vector<1x128xf32> to vector<128x128xf32>
    %30 = arith.addf %27, %29 : vector<128x128xf32>
    %c0_23 = arith.constant 0 : index
    %c0_24 = arith.constant 0 : index
    %31 = vector.load %arg10[%c0_23, %c0_24] : memref<128x128xf32, #tpu.memory_space<vmem>>, vector<128x128xf32>
    tpu.vector_store %arg10[%c0_23, %c0_24], %30 {strides = array<i32>} : memref<128x128xf32, #tpu.memory_space<vmem>>, vector<128x128xf32>,
    return
  }
  func.func @transform_0(%arg0: i32) -> (i32, i32) {
    %c0_i32 = arith.constant 0 : i32
    %c0_i32_0 = arith.constant 0 : i32
    return %arg0, %c0_i32 : i32, i32
  }
  func.func @transform_1(%arg0: i32) -> (i32, i32) {
    %c0_i32 = arith.constant 0 : i32
    %c0_i32_0 = arith.constant 0 : i32
    %c0_i32_1 = arith.constant 0 : i32
    return %c0_i32, %c0_i32_0 : i32, i32
  }
  func.func @transform_2(%arg0: i32) -> (i32, i32) {
    %c0_i32 = arith.constant 0 : i32
    %c0_i32_0 = arith.constant 0 : i32
    %c0_i32_1 = arith.constant 0 : i32
    return %c0_i32, %c0_i32_0 : i32, i32
  }
  func.func @transform_3(%arg0: i32) -> (i32, i32) {
    %c0_i32 = arith.constant 0 : i32
    %c0_i32_0 = arith.constant 0 : i32
    %c0_i32_1 = arith.constant 0 : i32
    return %c0_i32, %c0_i32_0 : i32, i32
  }
  func.func @transform_4(%arg0: i32) -> (i32, i32) {
    %c0_i32 = arith.constant 0 : i32
    %c0_i32_0 = arith.constant 0 : i32
    %c0_i32_1 = arith.constant 0 : i32
    return %c0_i32, %c0_i32_0 : i32, i32
  }
  func.func @transform_5(%arg0: i32) -> (i32, i32) {
    %c0_i32 = arith.constant 0 : i32
    %c0_i32_0 = arith.constant 0 : i32
    %c0_i32_1 = arith.constant 0 : i32
    return %c0_i32, %c0_i32_0 : i32, i32
  }
  func.func @transform_6(%arg0: i32) -> (i32, i32) {
    %c0_i32 = arith.constant 0 : i32
    %c0_i32_0 = arith.constant 0 : i32
    %c0_i32_1 = arith.constant 0 : i32
    return %c0_i32, %c0_i32_0 : i32, i32
  }
  func.func @transform_7(%arg0: i32) -> (i32, i32) {
    %c0_i32 = arith.constant 0 : i32
    %c0_i32_0 = arith.constant 0 : i32
    %c0_i32_1 = arith.constant 0 : i32
    return %c0_i32, %c0_i32_0 : i32, i32
  }
  func.func @transform_8(%arg0: i32) -> (i32, i32) {
    %c0_i32 = arith.constant 0 : i32
    %c0_i32_0 = arith.constant 0 : i32
    %c0_i32_1 = arith.constant 0 : i32
    return %c0_i32, %c0_i32_0 : i32, i32
  }
  func.func @transform_9(%arg0: i32) -> (i32, i32) {
    %c0_i32 = arith.constant 0 : i32
    %c0_i32_0 = arith.constant 0 : i32
    return %arg0, %c0_i32 : i32, i32
  }
}

</mosaic_0001>

<bundles_post_ra>
// kernel: linear_classification_forward.1
= control target key start
LH: loop header
LB: loop body
LE: loop exit
PB: predicated region body
PF: predicated region fallthrough
CT: control target
= control target key end

     0   :  { %s1485_s30 = smov 0   ;;  %s1649_s0 = inlined_call_operand.vmem [shape: f32[256,32], index: 0, kind: input, shape index: {}]   ;;  %s1650_s1 = inlined_call_operand.vmem [shape: bf16[32,128], index: 1, kind: input, shape index: {}]   ;;  %s1651_s2 = inlined_call_operand.vmem [shape: f32[1,128], index: 2, kind: input, shape index: {}]   ;;  %s1652_s3 = inlined_call_operand.vmem [shape: bf16[128,128], index: 3, kind: input, shape index: {}]   ;;  %s1653_s4 = inlined_call_operand.vmem [shape: f32[1,128], index: 4, kind: input, shape index: {}]   ;;  %s1654_s5 = inlined_call_operand.vmem [shape: bf16[128,128], index: 5, kind: input, shape index: {}]   ;;  %s1655_s6 = inlined_call_operand.vmem [shape: f32[1,128], index: 6, kind: input, shape index: {}]   ;;  %s1656_s7 = inlined_call_operand.vmem [shape: bf16[128,128], index: 7, kind: input, shape index: {}]   ;;  %s1657_s8 = inlined_call_operand.vmem [shape: f32[1,128], index: 8, kind: input, shape index: {}]   ;;  %s1658_s9 = inlined_call_operand.vmem [shape: f32[256,128], index: 9, kind: output, shape index: {}]  }
   0x1 LB: > { %s1154_s10 = sadd.s32 4294967295, %s1433_s30   ;;  %p1158_p0 = scmp.ge.s32.totalorder %s1433_s30, 1  ;;  %s1433_s30 = sphi %s1485_s30, %s19_s30  }
   0x2   : > { %p288_p1 = scmp.lt.s32.totalorder %s1433_s30, 3 }
   0x4   : > { %p289_p2 = pnand %p1158_p0, %p288_p1 }
   0x5   : > { %s1159_s13 = sshll.u32 (!%p289_p2), %s1154_s10, 4 }
   0x6   : > { %292 = sbr.rel (%p289_p2) target bundleno = 864 (0x360), region = 56  ;;  %p325_p3 = scmp.lt.s32.totalorder (!%p289_p2), %s1159_s13, 31 }
   0xb   : > { %v1401_v0 = vld [vmem:[%s1650_s1 + $0x8] sm:$0xff]   ;;  %v1402_v1 = vld [vmem:[%s1650_s1] sm:$0xff]   ;;  %v1403_v2 = vld [vmem:[%s1652_s3 + $0x38] sm:$0xff]   ;;  %s1660_s13 = smov (!%p325_p3, %s1159_s13), 31  ;;  %vm384_vm0 = vcmask 261120  }
   0xc   : > { %1261 = vmatprep.subr.bf16.mxu0 %v1401_v0  ;;  %v1404_v3 = vld [vmem:[%s1652_s3 + $0x30] sm:$0xff]   ;;  %1281 = vmatprep.subr.bf16.mxu1 %v1403_v2  ;;  %s1160_s20 = sshll.u32 %s1660_s13, 3  ;;  %v1405_v4 = vld [vmem:[%s1652_s3 + $0x28] sm:$0xff]   ;;  %v1406_v14 = vld [vmem:[%s1652_s3 + $0x20] sm:$0xff]  }
   0xd   : > { %1262 = vmatpush3.bf16.msra.mxu0 %v1401_v0  ;;  %1282 = vmatpush3.bf16.msra.mxu1 %v1403_v2  ;;  %s1513_s23 = scalar_lea.vmem %s1649_s0, %s1160_s20  ;;  %v1407_v19 = vld [vmem:[%s1652_s3 + $0x18] sm:$0xff]   ;;  %v1408_v31 = vld [vmem:[%s1652_s3 + $0x10] sm:$0xff]   ;;  %v1409_v32 = vld [vmem:[%s1652_s3 + $0x8] sm:$0xff]   ;;  %s1628_s24 = scalar_lea.vmem %s1658_s9, %s1160_s20 }
   0xe   : > { %1263 = vmatprep.subr.bf16.mxu0 %v1402_v1  ;;  %1283 = vmatprep.subr.bf16.mxu1 %v1404_v3  ;;  %v337_v5 = vld [vmem:[%s1513_s23] sm:$0xff]  ;;  %v338_v6 = vld [vmem:[%s1513_s23 + $0x8] sm:$0xff]  ;;  %v339_v7 = vld [vmem:[%s1513_s23 + $0x10] sm:$0xff] }
   0xf   : > { %v353_v8 = vpack.c.bf16 %v338_v6, %v337_v5  ;;  %v340_v9 = vld [vmem:[%s1513_s23 + $0x18] sm:$0xff]  ;;  %v341_v10 = vld [vmem:[%s1513_s23 + $0x20] sm:$0xff]  ;;  %v342_v11 = vld [vmem:[%s1513_s23 + $0x28] sm:$0xff] }
  0x10   : > { %v354_v12 = vpack.c.bf16 %v340_v9, %v339_v7  ;;  %v355_v13 = vpack.c.bf16 %v342_v11, %v341_v10  ;;  %v343_v15 = vld [vmem:[%s1513_s23 + $0x30] sm:$0xff]  ;;  %v344_v16 = vld [vmem:[%s1513_s23 + $0x38] sm:$0xff]  ;;  %v345_v17 = vld [vmem:[%s1513_s23 + $0x40] sm:$0xff] }
  0x11   : > { %1264 = vmatpush3.bf16.msra.mxu0 %v1402_v1  ;;  %1284 = vmatpush3.bf16.msra.mxu1 %v1404_v3  ;;  %v346_v18 = vld [vmem:[%s1513_s23 + $0x48] sm:$0xff]  ;;  %v356_v20 = vpack.c.bf16 %v344_v16, %v343_v15  ;;  %v347_v22 = vld [vmem:[%s1513_s23 + $0x50] sm:$0xff]  ;;  %v348_v23 = vld [vmem:[%s1513_s23 + $0x58] sm:$0xff] }
  0x12   : > { %1265 = vmatprep.mubr.msk.bf16.mxu0 %vm384_vm0, %v353_v8  ;;  %1285 = vmatprep.subr.bf16.mxu1 %v1405_v4  ;;  %v357_v21 = vpack.c.bf16 %v346_v18, %v345_v17  ;;  %v349_v24 = vld [vmem:[%s1513_s23 + $0x60] sm:$0xff]  ;;  %v350_v25 = vld [vmem:[%s1513_s23 + $0x68] sm:$0xff]  ;;  %v358_v26 = vpack.c.bf16 %v348_v23, %v347_v22  ;;  %v351_v28 = vld [vmem:[%s1513_s23 + $0x70] sm:$0xff] }
  0x13   : > { %v359_v27 = vpack.c.bf16 %v350_v25, %v349_v24  ;;  %v352_v29 = vld [vmem:[%s1513_s23 + $0x78] sm:$0xff]  ;;  %v1410_v33 = vld [vmem:[%s1652_s3] sm:$0xff]   ;;  %v1412_v35 = vld [vmem:[%s1654_s5 + $0x30] sm:$0xff]  }
  0x14   : > { %1266 = vmatmul.mubr.msk.bf16.vlgmr.msra.gmra.mxu0 %vm384_vm0, %v354_v12  ;;  %v360_v30 = vpack.c.bf16 %v352_v29, %v351_v28  ;;  %v1411_v34 = vld [vmem:[%s1654_s5 + $0x38] sm:$0xff]   ;;  %v1413_v36 = vld [vmem:[%s1654_s5 + $0x28] sm:$0xff]   ;;  %v1414_v37 = vld [vmem:[%s1654_s5 + $0x20] sm:$0xff]  }
  0x15   : > { %1269 = vmatprep.mubr.msk.bf16.mxu0 %vm384_vm0, %v355_v13  ;;  %1286 = vmatpush3.bf16.msra.mxu1 %v1405_v4  ;;  %v1415_v38 = vld [vmem:[%s1654_s5 + $0x18] sm:$0xff]   ;;  %v1163_v41 = vld [vmem:[%s1651_s2] ss:$0 sm:$0xff] }
  0x16   : > { %1287 = vmatprep.subr.bf16.mxu1 %v1406_v14  ;;  %1313 = vmatprep.subr.bf16.mxu0 %v1411_v34 }
  0x17   : > { %1314 = vmatpush3.bf16.msra.mxu0 %v1411_v34  ;;  %v1418_v34 = vld [vmem:[%s1654_s5] sm:$0xff]  }
  0x18   : > { %1315 = vmatprep.subr.bf16.mxu0 %v1412_v35 }
  0x19   : > { %1288 = vmatpush3.bf16.msra.mxu1 %v1406_v14 }
  0x1a   : > { %1289 = vmatprep.subr.bf16.mxu1 %v1407_v19 }
  0x1b   : > { %1316 = vmatpush3.bf16.msra.mxu0 %v1412_v35  ;;  %v1419_v35 = vld [vmem:[%s1656_s7 + $0x38] sm:$0xff]  }
  0x1c   : > { %1270 = vmatmul.mubr.msk.bf16.gmra.mxu0 %vm384_vm0, %v356_v20  ;;  %1317 = vmatprep.subr.bf16.mxu0 %v1413_v36 }
  0x1d   : > { %1273 = vmatprep.mubr.msk.bf16.mxu0 %vm384_vm0, %v357_v21  ;;  %1290 = vmatpush3.bf16.msra.mxu1 %v1407_v19 }
  0x1e   : > { %1291 = vmatprep.subr.bf16.mxu1 %v1408_v31 }
  0x1f   : > { %1318 = vmatpush3.bf16.msra.mxu0 %v1413_v36  ;;  %v1420_v36 = vld [vmem:[%s1656_s7 + $0x30] sm:$0xff]  }
  0x20   : > { %1319 = vmatprep.subr.bf16.mxu0 %v1414_v37 }
  0x21   : > { %1292 = vmatpush3.bf16.msra.mxu1 %v1408_v31 }
  0x22   : > { %1293 = vmatprep.subr.bf16.mxu1 %v1409_v32 }
  0x23   : > { %1320 = vmatpush3.bf16.msra.mxu0 %v1414_v37  ;;  %v1421_v37 = vld [vmem:[%s1656_s7 + $0x28] sm:$0xff]  }
  0x24   : > { %1274 = vmatmul.mubr.msk.bf16.gmra.mxu0 %vm384_vm0, %v358_v26  ;;  %1321 = vmatprep.subr.bf16.mxu0 %v1415_v38 }
  0x25   : > { %1277 = vmatprep.mubr.msk.bf16.mxu0 %vm384_vm0, %v359_v27  ;;  %1294 = vmatpush3.bf16.msra.mxu1 %v1409_v32  ;;  %v1416_v32 = vld [vmem:[%s1654_s5 + $0x10] sm:$0xff]  }
  0x26   : > { %1295 = vmatprep.subr.bf16.mxu1 %v1410_v33 }
  0x27   : > { %1322 = vmatpush3.bf16.msra.mxu0 %v1415_v38  ;;  %v1422_v38 = vld [vmem:[%s1656_s7 + $0x20] sm:$0xff]  }
  0x28   : > { %1323 = vmatprep.subr.bf16.mxu0 %v1416_v32 }
  0x29   : > { %1296 = vmatpush3.bf16.msra.mxu1 %v1410_v33  ;;  %v1417_v33 = vld [vmem:[%s1654_s5 + $0x8] sm:$0xff]  }
  0x2a   : > { %1377 = vmatprep.subr.bf16.mxu1 %v1419_v35 }
  0x2b   : > { %1324 = vmatpush3.bf16.msra.mxu0 %v1416_v32 }
  0x2c   : > { %1278 = vmatmul.mubr.msk.bf16.gmra.mxu0 %vm384_vm0, %v360_v30  ;;  %1325 = vmatprep.subr.bf16.mxu0 %v1417_v33 }
  0x2f   : > { %1326 = vmatpush3.bf16.msra.mxu0 %v1417_v33  ;;  %v1424_v33 = vld [vmem:[%s1656_s7 + $0x10] sm:$0xff]  }
  0x30   : > { %1327 = vmatprep.subr.bf16.mxu0 %v1418_v34 }
  0x33   : > { %1328 = vmatpush3.bf16.msra.mxu0 %v1418_v34  ;;  %v1425_v34 = vld [vmem:[%s1656_s7 + $0x8] sm:$0xff]  }
  0x34   : > { %1345 = vmatprep.subr.bf16.mxu0 %v1419_v35 }
  0xd4   : > { %v1267_v39 = vpop.f32.mrf.mxu0 }
  0xd5   : > { %v452_v45 = vadd.f32 %v1267_v39, %v1163_v41  ;;  %v1599_v39 = vld [vmem:[%s1656_s7 + $0x18] sm:$0xff]  }
  0xd6   : > { %v443_v40 = vpop.f32.mrf.mxu0 }
  0xd7   : > { %v444_v43 = vadd.f32 %v1163_v41, %v443_v40  ;;  %v508_v52 = vmax.f32 %v452_v45, 0.0 }
  0xd8   : > { %v1268_v42 = vpop.f32.mrf.mxu0 }
  0xd9   : > { %v455_v44 = vadd.f32 %v1268_v42, %v1163_v41  ;;  %v506_v50 = vmax.f32 %v444_v43, 0.0  ;;  %v1174_v42 = vld [vmem:[%s1653_s4] ss:$0 sm:$0xff] }
  0xda   : > { %v446_v46 = vpop.f32.mrf.mxu0 }
  0xdb   : > { %v447_v47 = vadd.f32 %v1163_v41, %v446_v46  ;;  %v509_v48 = vmax.f32 %v455_v44, 0.0 }
  0xdc   : > { %v1271_v49 = vpop.f32.mrf.mxu0 }
  0xdd   : > { %v507_v51 = vmax.f32 %v447_v47, 0.0  ;;  %v523_v55 = vpack.c.bf16 %v509_v48, %v508_v52  ;;  %v468_v59 = vadd.f32 %v1271_v49, %v1163_v41 }
  0xde   : > { %v459_v53 = vpop.f32.mrf.mxu0 }
  0xdf   : > { %v522_v54 = vpack.c.bf16 %v507_v51, %v506_v50  ;;  %v460_v57 = vadd.f32 %v1163_v41, %v459_v53  ;;  %v512_v2 = vmax.f32 %v468_v59, 0.0 }
  0xe0   : > { %v1272_v56 = vpop.f32.mrf.mxu0 }
  0xe1   : > { %v471_v58 = vadd.f32 %v1272_v56, %v1163_v41  ;;  %1297 = vmatprep.mubr.bf16.mxu1 %v522_v54  ;;  %v510_v0 = vmax.f32 %v460_v57, 0.0 }
  0xe2   : > { %v462_v60 = vpop.f32.mrf.mxu0  ;;  %1298 = vmatmul.mubr.bf16.vlgmr.msra.gmra.mxu1 %v523_v55 }
  0xe3   : > { %v463_v61 = vadd.f32 %v1163_v41, %v462_v60  ;;  %v513_v62 = vmax.f32 %v471_v58, 0.0  ;;  %1385 = vmatpush3.bf16.msra.mxu1 %v1419_v35 }
  0xe4   : > { %v1275_v63 = vpop.f32.mrf.mxu0  ;;  %1378 = vmatprep.subr.bf16.mxu1 %v1420_v36 }
  0xe5   : > { %v511_v1 = vmax.f32 %v463_v61, 0.0  ;;  %v525_v5 = vpack.c.bf16 %v513_v62, %v512_v2  ;;  %v484_v9 = vadd.f32 %v1275_v63, %v1163_v41 }
  0xe6   : > { %v475_v3 = vpop.f32.mrf.mxu0 }
  0xe7   : > { %v524_v4 = vpack.c.bf16 %v511_v1, %v510_v0  ;;  %v476_v7 = vadd.f32 %v1163_v41, %v475_v3  ;;  %v516_v16 = vmax.f32 %v484_v9, 0.0  ;;  %1386 = vmatpush3.bf16.msra.mxu1 %v1420_v36 }
  0xe8   : > { %v1276_v6 = vpop.f32.mrf.mxu0  ;;  %1379 = vmatprep.subr.bf16.mxu1 %v1421_v37 }
  0xe9   : > { %v487_v8 = vadd.f32 %v1276_v6, %v1163_v41  ;;  %1301 = vmatprep.mubr.bf16.mxu1 %v524_v4  ;;  %v514_v14 = vmax.f32 %v476_v7, 0.0 }
  0xea   : > { %v478_v10 = vpop.f32.mrf.mxu0  ;;  %1302 = vmatmul.mubr.bf16.gmra.mxu1 %v525_v5 }
  0xeb   : > { %v479_v11 = vadd.f32 %v1163_v41, %v478_v10  ;;  %v517_v12 = vmax.f32 %v487_v8, 0.0  ;;  %1387 = vmatpush3.bf16.msra.mxu1 %v1421_v37 }
  0xec   : > { %v1279_v13 = vpop.f32.mrf.mxu0  ;;  %1380 = vmatprep.subr.bf16.mxu1 %v1422_v38 }
  0xed   : > { %v515_v15 = vmax.f32 %v479_v11, 0.0  ;;  %v527_v19 = vpack.c.bf16 %v517_v12, %v516_v16  ;;  %v500_v23 = vadd.f32 %v1279_v13, %v1163_v41 }
  0xee   : > { %v491_v17 = vpop.f32.mrf.mxu0 }
  0xef   : > { %v526_v18 = vpack.c.bf16 %v515_v15, %v514_v14  ;;  %v492_v21 = vadd.f32 %v1163_v41, %v491_v17  ;;  %v520_v29 = vmax.f32 %v500_v23, 0.0  ;;  %1388 = vmatpush3.bf16.msra.mxu1 %v1422_v38 }
  0xf0   : > { %v1280_v20 = vpop.f32.mrf.mxu0  ;;  %1381 = vmatprep.subr.bf16.mxu1 %v1599_v39 }
  0xf1   : > { %v503_v22 = vadd.f32 %v1280_v20, %v1163_v41  ;;  %1305 = vmatprep.mubr.bf16.mxu1 %v526_v18  ;;  %v518_v27 = vmax.f32 %v492_v21, 0.0 }
  0xf2   : > { %v494_v24 = vpop.f32.mrf.mxu0  ;;  %1306 = vmatmul.mubr.bf16.gmra.mxu1 %v527_v19 }
  0xf3   : > { %v495_v25 = vadd.f32 %v1163_v41, %v494_v24  ;;  %v521_v26 = vmax.f32 %v503_v22, 0.0  ;;  %1389 = vmatpush3.bf16.msra.mxu1 %v1599_v39 }
  0xf4   : > { %1382 = vmatprep.subr.bf16.mxu1 %v1424_v33 }
  0xf5   : > { %v519_v28 = vmax.f32 %v495_v25, 0.0  ;;  %v529_v31 = vpack.c.bf16 %v521_v26, %v520_v29 }
  0xf7   : > { %v528_v30 = vpack.c.bf16 %v519_v28, %v518_v27  ;;  %1390 = vmatpush3.bf16.msra.mxu1 %v1424_v33 }
  0xf8   : > { %1383 = vmatprep.subr.bf16.mxu1 %v1425_v34 }
  0xf9   : > { %1309 = vmatprep.mubr.bf16.mxu1 %v528_v30 }
  0xfa   : > { %1310 = vmatmul.mubr.bf16.gmra.mxu1 %v529_v31 }
  0xfb   : > { %1391 = vmatpush3.bf16.msra.mxu1 %v1425_v34 }
 0x1a2   : > { %v1299_v40 = vpop.f32.mrf.mxu1 }
 0x1a3   : > { %v644_v46 = vadd.f32 %v1299_v40, %v1174_v42 }
 0x1a4   : > { %v635_v41 = vpop.f32.mrf.mxu1 }
 0x1a5   : > { %v636_v44 = vadd.f32 %v1174_v42, %v635_v41  ;;  %v700_v53 = vmax.f32 %v644_v46, 0.0 }
 0x1a6   : > { %v1300_v43 = vpop.f32.mrf.mxu1 }
 0x1a7   : > { %v647_v45 = vadd.f32 %v1300_v43, %v1174_v42  ;;  %v698_v51 = vmax.f32 %v636_v44, 0.0 }
 0x1a8   : > { %v638_v47 = vpop.f32.mrf.mxu1 }
 0x1a9   : > { %v639_v48 = vadd.f32 %v1174_v42, %v638_v47  ;;  %v701_v49 = vmax.f32 %v647_v45, 0.0 }
 0x1aa   : > { %v1303_v50 = vpop.f32.mrf.mxu1 }
 0x1ab   : > { %v699_v52 = vmax.f32 %v639_v48, 0.0  ;;  %v715_v56 = vpack.c.bf16 %v701_v49, %v700_v53  ;;  %v660_v60 = vadd.f32 %v1303_v50, %v1174_v42 }
 0x1ac   : > { %v651_v54 = vpop.f32.mrf.mxu1 }
 0x1ad   : > { %v714_v55 = vpack.c.bf16 %v699_v52, %v698_v51  ;;  %v652_v58 = vadd.f32 %v1174_v42, %v651_v54  ;;  %v704_v3 = vmax.f32 %v660_v60, 0.0 }
 0x1ae   : > { %v1304_v57 = vpop.f32.mrf.mxu1 }
 0x1af   : > { %v663_v59 = vadd.f32 %v1304_v57, %v1174_v42  ;;  %1329 = vmatprep.mubr.bf16.mxu0 %v714_v55  ;;  %v702_v1 = vmax.f32 %v652_v58, 0.0 }
 0x1b0   : > { %v654_v61 = vpop.f32.mrf.mxu1  ;;  %1330 = vmatmul.mubr.bf16.vlgmr.msra.gmra.mxu0 %v715_v56 }
 0x1b1   : > { %v655_v62 = vadd.f32 %v1174_v42, %v654_v61  ;;  %1346 = vmatpush3.bf16.msra.mxu0 %v1419_v35  ;;  %v705_v63 = vmax.f32 %v663_v59, 0.0  ;;  %v1426_v35 = vld [vmem:[%s1656_s7] sm:$0xff]  }
 0x1b2   : > { %v1307_v0 = vpop.f32.mrf.mxu1  ;;  %1347 = vmatprep.subr.bf16.mxu0 %v1420_v36  ;;  %1384 = vmatprep.subr.bf16.mxu1 %v1426_v35 }
 0x1b3   : > { %v703_v2 = vmax.f32 %v655_v62, 0.0  ;;  %v717_v6 = vpack.c.bf16 %v705_v63, %v704_v3  ;;  %v676_v10 = vadd.f32 %v1307_v0, %v1174_v42  ;;  %1392 = vmatpush3.bf16.msra.mxu1 %v1426_v35 }
 0x1b4   : > { %v667_v4 = vpop.f32.mrf.mxu1 }
 0x1b5   : > { %v716_v5 = vpack.c.bf16 %v703_v2, %v702_v1  ;;  %1348 = vmatpush3.bf16.msra.mxu0 %v1420_v36  ;;  %v668_v8 = vadd.f32 %v1174_v42, %v667_v4  ;;  %v708_v17 = vmax.f32 %v676_v10, 0.0 }
 0x1b6   : > { %v1308_v7 = vpop.f32.mrf.mxu1  ;;  %1349 = vmatprep.subr.bf16.mxu0 %v1421_v37 }
 0x1b7   : > { %v679_v9 = vadd.f32 %v1308_v7, %v1174_v42  ;;  %1333 = vmatprep.mubr.bf16.mxu0 %v716_v5  ;;  %v706_v15 = vmax.f32 %v668_v8, 0.0 }
 0x1b8   : > { %v670_v11 = vpop.f32.mrf.mxu1  ;;  %1334 = vmatmul.mubr.bf16.gmra.mxu0 %v717_v6 }
 0x1b9   : > { %v671_v12 = vadd.f32 %v1174_v42, %v670_v11  ;;  %1350 = vmatpush3.bf16.msra.mxu0 %v1421_v37  ;;  %v709_v13 = vmax.f32 %v679_v9, 0.0 }
 0x1ba   : > { %v1311_v14 = vpop.f32.mrf.mxu1  ;;  %1351 = vmatprep.subr.bf16.mxu0 %v1422_v38 }
 0x1bb   : > { %v707_v16 = vmax.f32 %v671_v12, 0.0  ;;  %v719_v20 = vpack.c.bf16 %v709_v13, %v708_v17  ;;  %v692_v24 = vadd.f32 %v1311_v14, %v1174_v42 }
 0x1bc   : > { %v683_v18 = vpop.f32.mrf.mxu1 }
 0x1bd   : > { %v718_v19 = vpack.c.bf16 %v707_v16, %v706_v15  ;;  %1352 = vmatpush3.bf16.msra.mxu0 %v1422_v38  ;;  %v684_v22 = vadd.f32 %v1174_v42, %v683_v18  ;;  %v712_v30 = vmax.f32 %v692_v24, 0.0  ;;  %v1183_v38 = vld [vmem:[%s1655_s6] ss:$0 sm:$0xff] }
 0x1be   : > { %v1312_v21 = vpop.f32.mrf.mxu1  ;;  %1353 = vmatprep.subr.bf16.mxu0 %v1599_v39 }
 0x1bf   : > { %v695_v23 = vadd.f32 %v1312_v21, %v1174_v42  ;;  %1337 = vmatprep.mubr.bf16.mxu0 %v718_v19  ;;  %v710_v28 = vmax.f32 %v684_v22, 0.0 }
 0x1c0   : > { %v686_v25 = vpop.f32.mrf.mxu1  ;;  %1338 = vmatmul.mubr.bf16.gmra.mxu0 %v719_v20 }
 0x1c1   : > { %v687_v26 = vadd.f32 %v1174_v42, %v686_v25  ;;  %1354 = vmatpush3.bf16.msra.mxu0 %v1599_v39  ;;  %v713_v27 = vmax.f32 %v695_v23, 0.0 }
 0x1c2   : > { %1355 = vmatprep.subr.bf16.mxu0 %v1424_v33 }
 0x1c3   : > { %v711_v29 = vmax.f32 %v687_v26, 0.0  ;;  %v721_v32 = vpack.c.bf16 %v713_v27, %v712_v30 }
 0x1c5   : > { %v720_v31 = vpack.c.bf16 %v711_v29, %v710_v28  ;;  %1356 = vmatpush3.bf16.msra.mxu0 %v1424_v33  ;;  %v1192_v29 = vld [vmem:[%s1657_s8] ss:$0 sm:$0xff] }
 0x1c6   : > { %1357 = vmatprep.subr.bf16.mxu0 %v1425_v34 }
 0x1c7   : > { %1341 = vmatprep.mubr.bf16.mxu0 %v720_v31 }
 0x1c8   : > { %1342 = vmatmul.mubr.bf16.gmra.mxu0 %v721_v32 }
 0x1c9   : > { %1358 = vmatpush3.bf16.msra.mxu0 %v1425_v34 }
 0x1ca   : > { %1359 = vmatprep.subr.bf16.mxu0 %v1426_v35 }
 0x1cd   : > { %1360 = vmatpush3.bf16.msra.mxu0 %v1426_v35 }
 0x270   : > { %v1331_v36 = vpop.f32.mrf.mxu0 }
 0x271   : > { %v836_v42 = vadd.f32 %v1331_v36, %v1183_v38 }
 0x272   : > { %v827_v37 = vpop.f32.mrf.mxu0 }
 0x273   : > { %v828_v40 = vadd.f32 %v1183_v38, %v827_v37  ;;  %v892_v49 = vmax.f32 %v836_v42, 0.0 }
 0x274   : > { %v1332_v39 = vpop.f32.mrf.mxu0 }
 0x275   : > { %v839_v41 = vadd.f32 %v1332_v39, %v1183_v38  ;;  %v890_v47 = vmax.f32 %v828_v40, 0.0 }
 0x276   : > { %v830_v43 = vpop.f32.mrf.mxu0 }
 0x277   : > { %v831_v44 = vadd.f32 %v1183_v38, %v830_v43  ;;  %v893_v45 = vmax.f32 %v839_v41, 0.0 }
 0x278   : > { %v1335_v46 = vpop.f32.mrf.mxu0 }
 0x279   : > { %v891_v48 = vmax.f32 %v831_v44, 0.0  ;;  %v907_v52 = vpack.c.bf16 %v893_v45, %v892_v49  ;;  %v852_v56 = vadd.f32 %v1335_v46, %v1183_v38 }
 0x27a   : > { %v843_v50 = vpop.f32.mrf.mxu0 }
 0x27b   : > { %v906_v51 = vpack.c.bf16 %v891_v48, %v890_v47  ;;  %v844_v54 = vadd.f32 %v1183_v38, %v843_v50  ;;  %v896_v63 = vmax.f32 %v852_v56, 0.0 }
 0x27c   : > { %v1336_v53 = vpop.f32.mrf.mxu0 }
 0x27d   : > { %v855_v55 = vadd.f32 %v1336_v53, %v1183_v38  ;;  %1361 = vmatprep.mubr.bf16.mxu0 %v906_v51  ;;  %v894_v61 = vmax.f32 %v844_v54, 0.0 }
 0x27e   : > { %v846_v57 = vpop.f32.mrf.mxu0  ;;  %1362 = vmatmul.mubr.bf16.vlgmr.msra.gmra.mxu0 %v907_v52 }
 0x27f   : > { %v847_v58 = vadd.f32 %v1183_v38, %v846_v57  ;;  %v897_v59 = vmax.f32 %v855_v55, 0.0 }
 0x280   : > { %v1339_v60 = vpop.f32.mrf.mxu0 }
 0x281   : > { %v895_v62 = vmax.f32 %v847_v58, 0.0  ;;  %v909_v2 = vpack.c.bf16 %v897_v59, %v896_v63  ;;  %v868_v6 = vadd.f32 %v1339_v60, %v1183_v38 }
 0x282   : > { %v859_v0 = vpop.f32.mrf.mxu0 }
 0x283   : > { %v908_v1 = vpack.c.bf16 %v895_v62, %v894_v61  ;;  %v860_v4 = vadd.f32 %v1183_v38, %v859_v0  ;;  %v900_v13 = vmax.f32 %v868_v6, 0.0 }
 0x284   : > { %v1340_v3 = vpop.f32.mrf.mxu0 }
 0x285   : > { %v871_v5 = vadd.f32 %v1340_v3, %v1183_v38  ;;  %1365 = vmatprep.mubr.bf16.mxu1 %v908_v1  ;;  %v898_v11 = vmax.f32 %v860_v4, 0.0 }
 0x286   : > { %v862_v7 = vpop.f32.mrf.mxu0  ;;  %1366 = vmatmul.mubr.bf16.vlgmr.msra.gmra.mxu1 %v909_v2 }
 0x287   : > { %v863_v8 = vadd.f32 %v1183_v38, %v862_v7  ;;  %v901_v9 = vmax.f32 %v871_v5, 0.0 }
 0x288   : > { %v1343_v10 = vpop.f32.mrf.mxu0 }
 0x289   : > { %v899_v12 = vmax.f32 %v863_v8, 0.0  ;;  %v911_v16 = vpack.c.bf16 %v901_v9, %v900_v13  ;;  %v884_v20 = vadd.f32 %v1343_v10, %v1183_v38 }
 0x28a   : > { %v875_v14 = vpop.f32.mrf.mxu0 }
 0x28b   : > { %v910_v15 = vpack.c.bf16 %v899_v12, %v898_v11  ;;  %v876_v18 = vadd.f32 %v1183_v38, %v875_v14  ;;  %v904_v26 = vmax.f32 %v884_v20, 0.0 }
 0x28c   : > { %v1344_v17 = vpop.f32.mrf.mxu0 }
 0x28d   : > { %v887_v19 = vadd.f32 %v1344_v17, %v1183_v38  ;;  %1369 = vmatprep.mubr.bf16.mxu1 %v910_v15  ;;  %v902_v24 = vmax.f32 %v876_v18, 0.0 }
 0x28e   : > { %v878_v21 = vpop.f32.mrf.mxu0  ;;  %1370 = vmatmul.mubr.bf16.gmra.mxu1 %v911_v16 }
 0x28f   : > { %v879_v22 = vadd.f32 %v1183_v38, %v878_v21  ;;  %v905_v23 = vmax.f32 %v887_v19, 0.0 }
 0x291   : > { %v903_v25 = vmax.f32 %v879_v22, 0.0  ;;  %v913_v28 = vpack.c.bf16 %v905_v23, %v904_v26 }
 0x293   : > { %v912_v27 = vpack.c.bf16 %v903_v25, %v902_v24 }
 0x295   : > { %1373 = vmatprep.mubr.bf16.mxu1 %v912_v27 }
 0x296   : > { %1374 = vmatmul.mubr.bf16.gmra.mxu1 %v913_v28 }
 0x33e   : > { %v1363_v30 = vpop.f32.mrf.mxu0 }
 0x33f   : > { %v1028_v31 = vadd.f32 %v1363_v30, %v1192_v29 }
 0x340   : > { %v1019_v32 = vpop.f32.mrf.mxu0 }
 0x341   : > { %1084 = vst [vmem:[%s1628_s24 + $0x10] sm:$0xff] %v1028_v31  ;;  %v1020_v33 = vadd.f32 %v1192_v29, %v1019_v32 }
 0x342   : > { %v1364_v34 = vpop.f32.mrf.mxu0 }
 0x343   : > { %1082 = vst [vmem:[%s1628_s24] sm:$0xff] %v1020_v33  ;;  %v1031_v35 = vadd.f32 %v1364_v34, %v1192_v29 }
 0x344   : > { %v1022_v36 = vpop.f32.mrf.mxu0 }
 0x345   : > { %1085 = vst [vmem:[%s1628_s24 + $0x18] sm:$0xff] %v1031_v35  ;;  %v1023_v37 = vadd.f32 %v1192_v29, %v1022_v36 }
 0x346   : > { %v1367_v38 = vpop.f32.mrf.mxu1 }
 0x347   : > { %1083 = vst [vmem:[%s1628_s24 + $0x8] sm:$0xff] %v1023_v37  ;;  %v1044_v39 = vadd.f32 %v1367_v38, %v1192_v29 }
 0x348   : > { %v1035_v40 = vpop.f32.mrf.mxu1 }
 0x349   : > { %1088 = vst [vmem:[%s1628_s24 + $0x30] sm:$0xff] %v1044_v39  ;;  %v1036_v41 = vadd.f32 %v1192_v29, %v1035_v40 }
 0x34a   : > { %v1368_v42 = vpop.f32.mrf.mxu1 }
 0x34b   : > { %1086 = vst [vmem:[%s1628_s24 + $0x20] sm:$0xff] %v1036_v41  ;;  %v1047_v43 = vadd.f32 %v1368_v42, %v1192_v29 }
 0x34c   : > { %v1038_v44 = vpop.f32.mrf.mxu1 }
 0x34d   : > { %1089 = vst [vmem:[%s1628_s24 + $0x38] sm:$0xff] %v1047_v43  ;;  %v1039_v45 = vadd.f32 %v1192_v29, %v1038_v44 }
 0x34e   : > { %v1371_v46 = vpop.f32.mrf.mxu1 }
 0x34f   : > { %1087 = vst [vmem:[%s1628_s24 + $0x28] sm:$0xff] %v1039_v45  ;;  %v1060_v47 = vadd.f32 %v1371_v46, %v1192_v29 }
 0x350   : > { %v1051_v48 = vpop.f32.mrf.mxu1 }
 0x351   : > { %1092 = vst [vmem:[%s1628_s24 + $0x50] sm:$0xff] %v1060_v47  ;;  %v1052_v49 = vadd.f32 %v1192_v29, %v1051_v48 }
 0x352   : > { %v1372_v50 = vpop.f32.mrf.mxu1 }
 0x353   : > { %1090 = vst [vmem:[%s1628_s24 + $0x40] sm:$0xff] %v1052_v49  ;;  %v1063_v51 = vadd.f32 %v1372_v50, %v1192_v29 }
 0x354   : > { %v1054_v52 = vpop.f32.mrf.mxu1 }
 0x355   : > { %1093 = vst [vmem:[%s1628_s24 + $0x58] sm:$0xff] %v1063_v51  ;;  %v1055_v53 = vadd.f32 %v1192_v29, %v1054_v52 }
 0x356   : > { %v1375_v54 = vpop.f32.mrf.mxu1 }
 0x357   : > { %1091 = vst [vmem:[%s1628_s24 + $0x48] sm:$0xff] %v1055_v53  ;;  %v1076_v55 = vadd.f32 %v1375_v54, %v1192_v29 }
 0x358   : > { %v1067_v56 = vpop.f32.mrf.mxu1 }
 0x359   : > { %1096 = vst [vmem:[%s1628_s24 + $0x70] sm:$0xff] %v1076_v55  ;;  %v1068_v57 = vadd.f32 %v1192_v29, %v1067_v56 }
 0x35a   : > { %v1376_v58 = vpop.f32.mrf.mxu1 }
 0x35b   : > { %1094 = vst [vmem:[%s1628_s24 + $0x60] sm:$0xff] %v1068_v57  ;;  %v1079_v59 = vadd.f32 %v1376_v58, %v1192_v29 }
 0x35c   : > { %v1070_v60 = vpop.f32.mrf.mxu1 }
 0x35d   : > { %1097 = vst [vmem:[%s1628_s24 + $0x78] sm:$0xff] %v1079_v59  ;;  %v1071_v61 = vadd.f32 %v1192_v29, %v1070_v60 }
 0x35f   : > { %1095 = vst [vmem:[%s1628_s24 + $0x68] sm:$0xff] %v1071_v61 }
 0x360 PF: > { %s19_s30 = sadd.s32 1, %s1433_s30  }
 0x361   : > { %p16_p4 = scmp.ge.s32.totalorder %s19_s30, 4  }
 0x363   :  { %18 = sbr.rel (!%p16_p4) target bundleno = 1 (0x1), region = 86 }

</bundles_post_ra>
